<compile_context>
chip_gen: v6e
topology: v6e:2x2x1
jax: 0.10.0
libtpu: 0.0.40
codegen_flags: <defaults>
</compile_context>

<pallas_src>
import jax
import jax.numpy as jnp
from jax.experimental import pallas as pl
from jax.experimental.pallas import tpu as pltpu


def _round_up(x, m):
    return (x + m - 1) // m * m


def _cdiv(a, b):
    return (a + b - 1) // b


def _fc_out_kernel(x_ref, w_ref, b_ref, o_ref):
    """One grid step: (tn, P*H) @ (P*H, P) + b -> (tn, P).

    x_ref : (tn, P*H) lane-packed activation rows (VMEM)
    w_ref : (P*H, P)  block-diagonal packed fc_out weight (VMEM, fetched once)
    b_ref : (1,)      fc_out bias (SMEM scalar)
    o_ref : (tn, P)   packed output
    """
    o_ref[...] = (
        jnp.dot(x_ref[...], w_ref[...], preferred_element_type=jnp.float32)
        + b_ref[0]
    ).astype(o_ref.dtype)


@jax.jit
def crystal_graph_conv_net_forward(crys_fea, weight, bias):
    """crys_fea: (N, H) f32; weight: (1, H) (PyTorch Linear layout); bias: (1,)."""
    N, H = crys_fea.shape

    # Lane-packing factor: fold P consecutive rows into one 128-lane row.
    P = 128 // H if (H < 128 and 128 % H == 0) else 1
    width = P * H

    # Pad rows only to the packing / sublane granule (8*P), never to the tile
    # size -> no full padded copy of the activation in HBM.
    granule = 8 * P
    n_pad = _round_up(N, granule)
    x = crys_fea if n_pad == N else jnp.pad(crys_fea, ((0, n_pad - N), (0, 0)))
    x = x.reshape(n_pad // P, width)     # contiguous reshape -> no data movement
    rows = n_pad // P

    # Block-diagonal packed weight (width, P); reduces to W.T when P == 1.
    w_row = weight.reshape(H).astype(jnp.float32)
    if P > 1:
        w_packed = (jnp.eye(P, dtype=jnp.float32)[:, None, :]
                    * w_row[None, :, None]).reshape(width, P)
    else:
        w_packed = w_row.reshape(H, 1)
    b = bias.reshape(1).astype(jnp.float32)

    # Tile rows by bytes (~8 MiB of activation per block).
    target_block_bytes = 8 << 20
    tn = max(8, (target_block_bytes // (width * 4)) // 8 * 8)
    if rows <= tn:
        # Still split into >=2 grid steps when there is enough work so the
        # row grid can shard across both TensorCores on v7x.
        tn = _round_up(_cdiv(rows, 2), 8) if rows >= 128 else rows
    grid = _cdiv(rows, tn)

    # Double-buffered input + output blocks, plus weight, plus headroom.
    x_blk = tn * width * 4
    o_blk = tn * P * 4
    vmem_limit = int(min(
        96 << 20,
        max(32 << 20, 2 * (x_blk + o_blk) + width * P * 4 + (4 << 20)),
    ))

    out = pl.pallas_call(
        _fc_out_kernel,
        out_shape=jax.ShapeDtypeStruct((rows, P), jnp.float32),
        grid_spec=pltpu.PrefetchScalarGridSpec(
            num_scalar_prefetch=0,
            grid=(grid,),
            in_specs=[
                pl.BlockSpec((tn, width), lambda i: (i, 0)),
                pl.BlockSpec((width, P), lambda i: (0, 0)),        # fetched once
                pl.BlockSpec(memory_space=pltpu.MemorySpace.SMEM),  # bias scalar
            ],
            out_specs=pl.BlockSpec((tn, P), lambda i: (i, 0)),
        ),
        compiler_params=pltpu.CompilerParams(
            dimension_semantics=("parallel",),
            vmem_limit_bytes=vmem_limit,
        ),
    )(x, w_packed, b)

    # (rows, P) -> (n_pad, 1) is again a contiguous reshape; drop pad rows.
    return out.reshape(n_pad, 1)[:N]


def _reference(crys_fea, weight, bias):
    """Pure-JAX reference of the PyTorch forward: crys_fea @ W.T + b."""
    return (jnp.dot(crys_fea, weight.T, precision=jax.lax.Precision.HIGHEST)
            + bias[None, :])


if __name__ == "__main__":
    key = jax.random.PRNGKey(0)
    k_x, k_w, k_b = jax.random.split(key, 3)

    # Spec-sized case: batch=2, h_fea_len=32.
    N, H = 2, 32
    crys_fea = jax.random.normal(k_x, (N, H), dtype=jnp.float32)

    # nn.Linear default init: U(-1/sqrt(fan_in), 1/sqrt(fan_in))
    bound = 1.0 / (H ** 0.5)
    weight = jax.random.uniform(k_w, (1, H), jnp.float32, -bound, bound)
    bias = jax.random.uniform(k_b, (1,), jnp.float32, -bound, bound)

    out = jax.block_until_ready(
        crystal_graph_conv_net_forward(crys_fea, weight, bias))
    ref = jax.block_until_ready(_reference(crys_fea, weight, bias))
    assert out.shape == (N, 1)
    assert jnp.max(jnp.abs(out - ref)) < 1e-4, "mismatch vs JAX reference (N=2)"

    # Secondary case exercising lane packing with a multi-step grid and a
    # ragged (cdiv) last block.
    N2 = 1030
    crys_fea2 = jax.random.normal(jax.random.PRNGKey(1), (N2, H), jnp.float32)
    out2 = jax.block_until_ready(
        crystal_graph_conv_net_forward(crys_fea2, weight, bias))
    ref2 = jax.block_until_ready(_reference(crys_fea2, weight, bias))
    assert out2.shape == (N2, 1)
    assert jnp.max(jnp.abs(out2 - ref2)) < 1e-4, "mismatch vs JAX reference (N=1030)"

    print("KERNEL_OK")
</pallas_src>

<mosaic_0001>
module attributes {stable_mosaic.version = 11 : i64} {
  func.func @_fc_out_kernel(%arg0: i32, %arg1: memref<8x128xf32, #tpu.memory_space<vmem>>, %arg2: memref<128x4xf32, #tpu.memory_space<vmem>>, %arg3: memref<1xf32, #tpu.memory_space<smem>>, %arg4: memref<8x4xf32, #tpu.memory_space<vmem>>) attributes {dimension_semantics = [#tpu.dimension_semantics<parallel>], iteration_bounds = array<i64: 1>, scalar_prefetch = 0 : i64, scratch_operands = 0 : i64, tpu.core_type = #tpu.core_type<tc>, window_params = [{transform_indices = @transform_0, window_bounds = array<i64: 8, 128>}, {pipeline_mode = #tpu.pipeline_mode<synchronous>, transform_indices = @transform_1, window_bounds = array<i64: 128, 4>}, {transform_indices = @transform_2, window_bounds = array<i64: 1>}, {transform_indices = @transform_3, window_bounds = array<i64: 8, 4>}]} {
    %c0 = arith.constant 0 : index
    %c0_0 = arith.constant 0 : index
    %0 = vector.load %arg1[%c0, %c0_0] : memref<8x128xf32, #tpu.memory_space<vmem>>, vector<8x128xf32>
    %c0_1 = arith.constant 0 : index
    %c0_2 = arith.constant 0 : index
    %1 = vector.load %arg2[%c0_1, %c0_2] : memref<128x4xf32, #tpu.memory_space<vmem>>, vector<128x4xf32>
    %cst = arith.constant dense<0.000000e+00> : vector<8x4xf32>
    %2 = tpu.matmul %0, %1, %cst {dimension_numbers = #tpu.dot_dimension_numbers<[1], [0], [0], [1], [0, 0, 1, 1], [], []>} : vector<8x128xf32>, vector<128x4xf32>, vector<8x4xf32> -> vector<8x4xf32>
    %c0_3 = arith.constant 0 : index
    %3 = memref.load %arg3[%c0_3] : memref<1xf32, #tpu.memory_space<smem>>
    %4 = vector.broadcast %3 : f32 to vector<8x4xf32>
    %5 = arith.addf %2, %4 : vector<8x4xf32>
    %c0_4 = arith.constant 0 : index
    %c0_5 = arith.constant 0 : index
    %6 = vector.load %arg4[%c0_4, %c0_5] : memref<8x4xf32, #tpu.memory_space<vmem>>, vector<8x4xf32>
    tpu.vector_store %arg4[%c0_4, %c0_5], %5 {strides = array<i32>} : memref<8x4xf32, #tpu.memory_space<vmem>>, vector<8x4xf32>,
    return
  }
  func.func @transform_0(%arg0: i32) -> (i32, i32) {
    %c0_i32 = arith.constant 0 : i32
    %c0_i32_0 = arith.constant 0 : i32
    return %arg0, %c0_i32 : i32, i32
  }
  func.func @transform_1(%arg0: i32) -> (i32, i32) {
    %c0_i32 = arith.constant 0 : i32
    %c0_i32_0 = arith.constant 0 : i32
    %c0_i32_1 = arith.constant 0 : i32
    return %c0_i32, %c0_i32_0 : i32, i32
  }
  func.func @transform_2(%arg0: i32) -> i32 {
    %c0_i32 = arith.constant 0 : i32
    %c0_i32_0 = arith.constant 0 : i32
    return %c0_i32 : i32
  }
  func.func @transform_3(%arg0: i32) -> (i32, i32) {
    %c0_i32 = arith.constant 0 : i32
    %c0_i32_0 = arith.constant 0 : i32
    return %arg0, %c0_i32 : i32, i32
  }
}

</mosaic_0001>

<bundles_post_ra>
// kernel: crystal_graph_conv_net_forward.1
= control target key start
LH: loop header
LB: loop body
LE: loop exit
PB: predicated region body
PF: predicated region fallthrough
CT: control target
= control target key end

     0   :  { %v164_v0 = vmov 0.0   ;;  %vm165_vm0 = vmmov 0   ;;  %vm104_vm1 = vcmask 31744   ;;  %s243_s1 = inlined_call_operand.vmem [shape: f32[128,4], index: 1, kind: input, shape index: {}]   ;;  %s244_s0 = inlined_call_operand.vmem [shape: f32[8,128], index: 0, kind: input, shape index: {}]   ;;  %s245_s2 = inlined_call_operand.<no memory space> [shape: f32[1], index: 2, kind: input, shape index: {}]   ;;  %s246_s3 = inlined_call_operand.vmem [shape: f32[8,4], index: 3, kind: output, shape index: {}]  }
   0x1   :  { %127 = vmatprep.subr.mxu0 %v164_v0  ;;  %v31_v1 = vld [vmem:[%s243_s1 + $0x78] sm:$0xff]  ;;  %v30_v2 = vld [vmem:[%s243_s1 + $0x70] sm:$0xff]  ;;  %159 = vmatprep.mubr.msk.f32.mxu0 %vm165_vm0, %v164_v0  ;;  %v29_v3 = vld [vmem:[%s243_s1 + $0x68] sm:$0xff]  ;;  %v33_v18 = vstv %s245_s2 }
   0x2   :  { %128 = vmatpush3.msra.mxu0 %v31_v1  ;;  %v28_v4 = vld [vmem:[%s243_s1 + $0x60] sm:$0xff]  ;;  %v27_v5 = vld [vmem:[%s243_s1 + $0x58] sm:$0xff]  ;;  %v26_v6 = vld [vmem:[%s243_s1 + $0x50] sm:$0xff] }
   0x3   :  { %129 = vmatprep.subr.mxu0 %v164_v0  ;;  %v25_v7 = vld [vmem:[%s243_s1 + $0x48] sm:$0xff]  ;;  %v24_v8 = vld [vmem:[%s243_s1 + $0x40] sm:$0xff]  ;;  %v23_v9 = vld [vmem:[%s243_s1 + $0x38] sm:$0xff] }
   0x4   :  { %130 = vmatpush3.msra.mxu0 %v30_v2  ;;  %v22_v10 = vld [vmem:[%s243_s1 + $0x30] sm:$0xff]  ;;  %v21_v11 = vld [vmem:[%s243_s1 + $0x28] sm:$0xff]  ;;  %v20_v12 = vld [vmem:[%s243_s1 + $0x20] sm:$0xff] }
   0x5   :  { %131 = vmatprep.subr.mxu0 %v164_v0  ;;  %v19_v13 = vld [vmem:[%s243_s1 + $0x18] sm:$0xff]  ;;  %v18_v14 = vld [vmem:[%s243_s1 + $0x10] sm:$0xff]  ;;  %v17_v15 = vld [vmem:[%s243_s1 + $0x8] sm:$0xff] }
   0x6   :  { %132 = vmatpush3.msra.mxu0 %v29_v3  ;;  %v16_v16 = vld [vmem:[%s243_s1] sm:$0xff] }
   0x7   :  { %133 = vmatprep.subr.mxu0 %v164_v0  ;;  %v15_v17 = vld [vmem:[%s244_s0] sm:$0xff] }
   0x8   :  { %134 = vmatpush3.msra.mxu0 %v28_v4 }
   0x9   :  { %135 = vmatprep.subr.mxu0 %v164_v0 }
   0xa   :  { %136 = vmatpush3.msra.mxu0 %v27_v5 }
   0xb   :  { %137 = vmatprep.subr.mxu0 %v164_v0 }
   0xc   :  { %138 = vmatpush3.msra.mxu0 %v26_v6 }
   0xd   :  { %139 = vmatprep.subr.mxu0 %v164_v0 }
   0xe   :  { %140 = vmatpush3.msra.mxu0 %v25_v7 }
   0xf   :  { %141 = vmatprep.subr.mxu0 %v164_v0 }
  0x10   :  { %142 = vmatpush3.msra.mxu0 %v24_v8 }
  0x11   :  { %143 = vmatprep.subr.mxu0 %v164_v0 }
  0x12   :  { %144 = vmatpush3.msra.mxu0 %v23_v9 }
  0x13   :  { %145 = vmatprep.subr.mxu0 %v164_v0 }
  0x14   :  { %146 = vmatpush3.msra.mxu0 %v22_v10 }
  0x15   :  { %147 = vmatprep.subr.mxu0 %v164_v0 }
  0x16   :  { %148 = vmatpush3.msra.mxu0 %v21_v11 }
  0x17   :  { %149 = vmatprep.subr.mxu0 %v164_v0 }
  0x18   :  { %150 = vmatpush3.msra.mxu0 %v20_v12 }
  0x19   :  { %151 = vmatprep.subr.mxu0 %v164_v0 }
  0x1a   :  { %152 = vmatpush3.msra.mxu0 %v19_v13 }
  0x1b   :  { %153 = vmatprep.subr.mxu0 %v164_v0 }
  0x1c   :  { %154 = vmatpush3.msra.mxu0 %v18_v14 }
  0x1d   :  { %155 = vmatprep.subr.mxu0 %v164_v0 }
  0x1e   :  { %156 = vmatpush3.msra.mxu0 %v17_v15 }
  0x1f   :  { %157 = vmatprep.subr.mxu0 %v164_v0 }
  0x20   :  { %158 = vmatpush3.msra.mxu0 %v16_v16 }
  0x21   :  { %160 = vmatmul.mubr.f32.vlgmr.msra.gmra.mxu0 %v15_v17 }
  0xe1   :  { %v100_v19 = vpop.f32.mrf.mxu0 }
  0xe2   :  { %v101_v20 = vadd.f32 %v100_v19, %v33_v18 }
  0xe3   :  { %v161_v21 = vpop.f32.mrf.mxu0 }
  0xe4   :  { %105 = vst.msk [vmem:[%s246_s3] sm:$0xff] %vm104_vm1, %v101_v20 }

</bundles_post_ra>
